<compile_context>
chip_gen: v7x
topology: tpu7x:2x2x1
jax: 0.10.0
libtpu: 0.0.40
codegen_flags: <defaults>
</compile_context>

<pallas_src>
import functools

import jax
import jax.numpy as jnp
import numpy as np
from jax.experimental import pallas as pl
from jax.experimental.pallas import tpu as pltpu

NEG_SLOPE = 0.01   # nn.LeakyReLU default
EPS = 1e-5         # nn.InstanceNorm2d default (affine=False, biased variance)


# ----------------------------- wrapper-side weight prep -----------------------------
def _toeplitz_slabs(w_hwio, W):
    """Fold the 3x3 conv (and its W-direction zero padding) into three
    block-Toeplitz weight slabs, one per kh:

        B[kh, wi*Ci + ci, wo*Co + co] = w_hwio[kh, wi - wo + 1, ci, co]
                                        if 0 <= wi - wo + 1 <= 2 else 0

    so that conv3x3(x)[h, wo*Co + co] = sum_kh (row-shifted x)[h, :] @ B[kh].
    Weight-only layout preparation (tiny, done once per call in the wrapper)."""
    _, _, Ci, Co = w_hwio.shape
    wi = jnp.arange(W)[:, None]                        # input spatial position
    wo = jnp.arange(W)[None, :]                        # output spatial position
    kw = wi - wo + 1                                   # (W, W)
    valid = (kw >= 0) & (kw <= 2)
    kw_c = jnp.clip(kw, 0, 2)
    g = w_hwio[:, kw_c, :, :]                          # (3, W, W, Ci, Co)
    g = jnp.where(valid[None, :, :, None, None], g, 0.0)
    g = jnp.transpose(g, (0, 1, 3, 2, 4))              # (3, wi, ci, wo, co)
    return g.reshape(3, W * Ci, W * Co)


# ----------------------------------- kernel ----------------------------------------
def _channel_sum_bcast(row, W, Cout):
    """row: (1, W*Cout), lane = w*Cout + co.  Returns the per-channel sum over
    the W positions, broadcast back to every lane of that channel, via a
    log2(W) roll(+add) tree (XLU rolls occupy their own VLIW slot)."""
    shift = Cout
    while shift < W * Cout:
        row = row + pltpu.roll(row, shift=shift, axis=1)
        shift *= 2
    return row


def _stage(a, b_ref, H, W, Cout):
    """One Conv3x3(pad=1) -> InstanceNorm2d(affine=False) -> LeakyReLU stage.
    a: (H, W*Cin) f32 value, lane = w*Cin + ci.
    b_ref: (3, W*Cin, W*Cout) block-Toeplitz weight slabs (kh = 0, 1, 2).
    Returns (H, W*Cout) f32, lane = w*Cout + co (lane-dense output layout)."""
    D = a.shape[-1]
    zrow = jnp.zeros((1, D), jnp.float32)
    a_dn = jnp.concatenate([zrow, a[:-1, :]], axis=0)   # row h -> x[h-1]  (kh=0)
    a_up = jnp.concatenate([a[1:, :], zrow], axis=0)    # row h -> x[h+1]  (kh=2)

    acc = jnp.dot(a_dn, b_ref[0], preferred_element_type=jnp.float32)
    acc += jnp.dot(a, b_ref[1], preferred_element_type=jnp.float32)
    acc += jnp.dot(a_up, b_ref[2], preferred_element_type=jnp.float32)
    # acc: (H, W*Cout) -- already the lane-dense output layout, no relayout.

    # InstanceNorm2d (affine=False): per-channel spatial mean / biased variance,
    # single pass, computed entirely on lane-dense data.
    inv_n = 1.0 / float(H * W)
    s = _channel_sum_bcast(jnp.sum(acc, axis=0, keepdims=True), W, Cout)
    ss = _channel_sum_bcast(jnp.sum(acc * acc, axis=0, keepdims=True), W, Cout)
    mean = s * inv_n
    var = ss * inv_n - mean * mean
    y = (acc - mean) * jax.lax.rsqrt(var + EPS)

    # LeakyReLU(0.01)
    return jnp.where(y >= 0.0, y, NEG_SLOPE * y)


def stadge_kernel(x_ref, b1_ref, b2_ref, o_ref, *, H, W, Cout):
    # x_ref : (1, H, W*Cin)          lane-dense input slab for this image
    # b1_ref: (3, W*Cin,  W*Cout)    stage-1 block-Toeplitz weights
    # b2_ref: (3, W*Cout, W*Cout)    stage-2 block-Toeplitz weights
    # o_ref : (1, H, W*Cout)         lane-dense output slab (W*Cout = 128)
    x = x_ref[0]                                  # (H, W*Cin) f32
    y1 = _stage(x, b1_ref, H, W, Cout)            # (H, W*Cout)
    y2 = _stage(y1, b2_ref, H, W, Cout)           # (H, W*Cout)
    o_ref[0] = y2.astype(o_ref.dtype)             # unmasked, lane-dense store


# ---------------------------------- wrapper -----------------------------------------
def stadge_block(x_nhwc, w1, b1, w2, b2):
    """x_nhwc: (N, H, W, Cin) f32; w*: (3, 3, Ci, Co) HWIO; b*: (Co,).
    Returns (N, H, W, Cout) f32.

    The conv biases are accepted for API parity but NOT sent to the kernel:
    InstanceNorm2d(affine=False) subtracts the per-channel spatial mean right
    after the bias add, so b1/b2 cancel exactly (verified vs the reference)."""
    del b1, b2
    N, H, W, Cin = x_nhwc.shape
    Cout = w1.shape[-1]
    assert W & (W - 1) == 0, "roll-tree channel reduction assumes power-of-two W"
    # NOTE: W*Cout == 128 at the example shapes -> unmasked lane-dense output
    # stores; keep W*Cout a multiple of 128 (pad Cout / tile W) for other shapes.

    # Layout plumbing only (no activation compute hoisted into the wrapper).
    x2 = x_nhwc.reshape(N, H, W * Cin)
    b1s = _toeplitz_slabs(w1, W)                  # (3, W*Cin,  W*Cout)
    b2s = _toeplitz_slabs(w2, W)                  # (3, W*Cout, W*Cout)

    flops = N * 2 * H * 3 * ((W * Cin) * (W * Cout) + (W * Cout) * (W * Cout))
    bytes_accessed = 4 * (x2.size + N * H * W * Cout + b1s.size + b2s.size)
    cost = pl.CostEstimate(flops=flops, transcendentals=2 * N * W * Cout,
                           bytes_accessed=bytes_accessed)

    kernel = functools.partial(stadge_kernel, H=H, W=W, Cout=Cout)
    out = pl.pallas_call(
        kernel,
        out_shape=jax.ShapeDtypeStruct((N, H, W * Cout), jnp.float32),
        grid_spec=pltpu.PrefetchScalarGridSpec(
            num_scalar_prefetch=0,
            grid=(N,),
            in_specs=[
                pl.BlockSpec((1, H, W * Cin), lambda n: (n, 0, 0)),
                pl.BlockSpec((3, W * Cin, W * Cout), lambda n: (0, 0, 0)),
                pl.BlockSpec((3, W * Cout, W * Cout), lambda n: (0, 0, 0)),
            ],
            out_specs=pl.BlockSpec((1, H, W * Cout), lambda n: (n, 0, 0)),
        ),
        compiler_params=pltpu.CompilerParams(
            dimension_semantics=("parallel",)),
        cost_estimate=cost,
    )(x2, b1s, b2s)
    return out.reshape(N, H, W, Cout)


# ---------------------- pure-JAX reference (for checking) ---------------------------
# The reference KEEPS the conv biases, demonstrating that dropping them in the
# kernel is exact (they cancel under InstanceNorm2d(affine=False)).
def _ref_stage(x, w, b):
    y = jax.lax.conv_general_dilated(
        x, w, window_strides=(1, 1), padding=((1, 1), (1, 1)),
        dimension_numbers=("NHWC", "HWIO", "NHWC"))
    y = y + b.reshape(1, 1, 1, -1)
    mean = jnp.mean(y, axis=(1, 2), keepdims=True)
    var = jnp.mean((y - mean) ** 2, axis=(1, 2), keepdims=True)
    y = (y - mean) * jax.lax.rsqrt(var + EPS)
    return jnp.where(y >= 0, y, NEG_SLOPE * y)


def ref_forward(x_nhwc, w1, b1, w2, b2):
    return _ref_stage(_ref_stage(x_nhwc, w1, b1), w2, b2)


if __name__ == "__main__":
    N, Cin, Cout, H, W = 2, 4, 8, 16, 16   # W*Cout = 128 -> lane-dense output

    key = jax.random.PRNGKey(0)
    kx, k1, k2, k3, k4 = jax.random.split(key, 5)

    # PyTorch-style NCHW input, moved to the kernel's NHWC layout.
    x_nchw = jax.random.normal(kx, (N, Cin, H, W), jnp.float32)
    x_nhwc = jnp.transpose(x_nchw, (0, 2, 3, 1))

    # Deterministic synthetic parameters (shapes from nn.Conv2d in __init__).
    w1 = jax.random.normal(k1, (3, 3, Cin, Cout), jnp.float32) * 0.1
    b1 = jax.random.normal(k2, (Cout,), jnp.float32) * 0.1
    w2 = jax.random.normal(k3, (3, 3, Cout, Cout), jnp.float32) * 0.1
    b2 = jax.random.normal(k4, (Cout,), jnp.float32) * 0.1

    out = jax.block_until_ready(stadge_block(x_nhwc, w1, b1, w2, b2))
    ref = ref_forward(x_nhwc, w1, b1, w2, b2)

    assert out.shape == (N, H, W, Cout)
    err = float(np.max(np.abs(np.asarray(out) - np.asarray(ref))))
    assert np.allclose(np.asarray(out), np.asarray(ref), rtol=2e-4, atol=2e-4), \
        f"Pallas kernel output does not match reference (max abs err {err})"

    print("KERNEL_OK")
</pallas_src>

<mosaic_0001>
module attributes {stable_mosaic.version = 11 : i64} {
  func.func @stadge_kernel(%arg0: i32, %arg1: memref<1x16x64xf32, #tpu.memory_space<vmem>>, %arg2: memref<3x64x128xf32, #tpu.memory_space<vmem>>, %arg3: memref<3x128x128xf32, #tpu.memory_space<vmem>>, %arg4: memref<1x16x128xf32, #tpu.memory_space<vmem>>) attributes {dimension_semantics = [#tpu.dimension_semantics<parallel>], iteration_bounds = array<i64: 2>, scalar_prefetch = 0 : i64, scratch_operands = 0 : i64, tpu.core_type = #tpu.core_type<tc>, window_params = [{transform_indices = @transform_0, window_bounds = array<i64: 1, 16, 64>}, {pipeline_mode = #tpu.pipeline_mode<synchronous>, transform_indices = @transform_1, window_bounds = array<i64: 3, 64, 128>}, {pipeline_mode = #tpu.pipeline_mode<synchronous>, transform_indices = @transform_2, window_bounds = array<i64: 3, 128, 128>}, {transform_indices = @transform_3, window_bounds = array<i64: 1, 16, 128>}]} {
    %c0 = arith.constant 0 : index
    %c0_0 = arith.constant 0 : index
    %c0_1 = arith.constant 0 : index
    %0 = vector.load %arg1[%c0, %c0_0, %c0_1] : memref<1x16x64xf32, #tpu.memory_space<vmem>>, vector<1x16x64xf32>
    %1 = vector.shape_cast %0 : vector<1x16x64xf32> to vector<16x64xf32>
    %cst = arith.constant 0.000000e+00 : f32
    %2 = vector.broadcast %cst : f32 to vector<1x64xf32>
    %3 = vector.extract_strided_slice %1 {offsets = [0, 0], sizes = [15, 64], strides = [1, 1]} : vector<16x64xf32> to vector<15x64xf32>
    %4 = tpu.concatenate %2, %3 in 0 : vector<1x64xf32>, vector<15x64xf32> -> vector<16x64xf32>
    %5 = vector.extract_strided_slice %1 {offsets = [1, 0], sizes = [15, 64], strides = [1, 1]} : vector<16x64xf32> to vector<15x64xf32>
    %6 = tpu.concatenate %5, %2 in 0 : vector<15x64xf32>, vector<1x64xf32> -> vector<16x64xf32>
    %c0_2 = arith.constant 0 : index
    %c0_3 = arith.constant 0 : index
    %c0_4 = arith.constant 0 : index
    %7 = vector.load %arg2[%c0_2, %c0_3, %c0_4] : memref<3x64x128xf32, #tpu.memory_space<vmem>>, vector<1x64x128xf32>
    %8 = vector.shape_cast %7 : vector<1x64x128xf32> to vector<64x128xf32>
    %cst_5 = arith.constant dense<0.000000e+00> : vector<16x128xf32>
    %9 = tpu.matmul %4, %8, %cst_5 {dimension_numbers = #tpu.dot_dimension_numbers<[1], [0], [0], [1], [0, 0, 1, 1], [], []>} : vector<16x64xf32>, vector<64x128xf32>, vector<16x128xf32> -> vector<16x128xf32>
    %c1 = arith.constant 1 : index
    %c0_6 = arith.constant 0 : index
    %c0_7 = arith.constant 0 : index
    %10 = vector.load %arg2[%c1, %c0_6, %c0_7] : memref<3x64x128xf32, #tpu.memory_space<vmem>>, vector<1x64x128xf32>
    %11 = vector.shape_cast %10 : vector<1x64x128xf32> to vector<64x128xf32>
    %cst_8 = arith.constant dense<0.000000e+00> : vector<16x128xf32>
    %12 = tpu.matmul %1, %11, %cst_8 {dimension_numbers = #tpu.dot_dimension_numbers<[1], [0], [0], [1], [0, 0, 1, 1], [], []>} : vector<16x64xf32>, vector<64x128xf32>, vector<16x128xf32> -> vector<16x128xf32>
    %13 = arith.addf %9, %12 : vector<16x128xf32>
    %c2 = arith.constant 2 : index
    %c0_9 = arith.constant 0 : index
    %c0_10 = arith.constant 0 : index
    %14 = vector.load %arg2[%c2, %c0_9, %c0_10] : memref<3x64x128xf32, #tpu.memory_space<vmem>>, vector<1x64x128xf32>
    %15 = vector.shape_cast %14 : vector<1x64x128xf32> to vector<64x128xf32>
    %cst_11 = arith.constant dense<0.000000e+00> : vector<16x128xf32>
    %16 = tpu.matmul %6, %15, %cst_11 {dimension_numbers = #tpu.dot_dimension_numbers<[1], [0], [0], [1], [0, 0, 1, 1], [], []>} : vector<16x64xf32>, vector<64x128xf32>, vector<16x128xf32> -> vector<16x128xf32>
    %17 = arith.addf %13, %16 : vector<16x128xf32>
    %cst_12 = arith.constant dense<0.000000e+00> : vector<128xf32>
    %18 = vector.multi_reduction <add>, %17, %cst_12 [0] : vector<16x128xf32> to vector<128xf32>
    %19 = vector.shape_cast %18 : vector<128xf32> to vector<1x128xf32>
    %c8_i32 = arith.constant 8 : i32
    %20 = tpu.dynamic_rotate %19 by %c8_i32 dim 1 : vector<1x128xf32>, i32 -> vector<1x128xf32>
    %21 = arith.addf %19, %20 : vector<1x128xf32>
    %c16_i32 = arith.constant 16 : i32
    %22 = tpu.dynamic_rotate %21 by %c16_i32 dim 1 : vector<1x128xf32>, i32 -> vector<1x128xf32>
    %23 = arith.addf %21, %22 : vector<1x128xf32>
    %c32_i32 = arith.constant 32 : i32
    %24 = tpu.dynamic_rotate %23 by %c32_i32 dim 1 : vector<1x128xf32>, i32 -> vector<1x128xf32>
    %25 = arith.addf %23, %24 : vector<1x128xf32>
    %c64_i32 = arith.constant 64 : i32
    %26 = tpu.dynamic_rotate %25 by %c64_i32 dim 1 : vector<1x128xf32>, i32 -> vector<1x128xf32>
    %27 = arith.addf %25, %26 : vector<1x128xf32>
    %28 = arith.mulf %17, %17 : vector<16x128xf32>
    %cst_13 = arith.constant dense<0.000000e+00> : vector<128xf32>
    %29 = vector.multi_reduction <add>, %28, %cst_13 [0] : vector<16x128xf32> to vector<128xf32>
    %30 = vector.shape_cast %29 : vector<128xf32> to vector<1x128xf32>
    %c8_i32_14 = arith.constant 8 : i32
    %31 = tpu.dynamic_rotate %30 by %c8_i32_14 dim 1 : vector<1x128xf32>, i32 -> vector<1x128xf32>
    %32 = arith.addf %30, %31 : vector<1x128xf32>
    %c16_i32_15 = arith.constant 16 : i32
    %33 = tpu.dynamic_rotate %32 by %c16_i32_15 dim 1 : vector<1x128xf32>, i32 -> vector<1x128xf32>
    %34 = arith.addf %32, %33 : vector<1x128xf32>
    %c32_i32_16 = arith.constant 32 : i32
    %35 = tpu.dynamic_rotate %34 by %c32_i32_16 dim 1 : vector<1x128xf32>, i32 -> vector<1x128xf32>
    %36 = arith.addf %34, %35 : vector<1x128xf32>
    %c64_i32_17 = arith.constant 64 : i32
    %37 = tpu.dynamic_rotate %36 by %c64_i32_17 dim 1 : vector<1x128xf32>, i32 -> vector<1x128xf32>
    %38 = arith.addf %36, %37 : vector<1x128xf32>
    %cst_18 = arith.constant 3.906250e-03 : f32
    %39 = vector.broadcast %cst_18 : f32 to vector<1x128xf32>
    %40 = arith.mulf %27, %39 : vector<1x128xf32>
    %cst_19 = arith.constant 3.906250e-03 : f32
    %41 = vector.broadcast %cst_19 : f32 to vector<1x128xf32>
    %42 = arith.mulf %38, %41 : vector<1x128xf32>
    %43 = arith.mulf %40, %40 : vector<1x128xf32>
    %44 = arith.subf %42, %43 : vector<1x128xf32>
    %45 = vector.broadcast %40 : vector<1x128xf32> to vector<16x128xf32>
    %46 = arith.subf %17, %45 : vector<16x128xf32>
    %cst_20 = arith.constant 9.99999974E-6 : f32
    %47 = vector.broadcast %cst_20 : f32 to vector<1x128xf32>
    %48 = arith.addf %44, %47 : vector<1x128xf32>
    %49 = math.rsqrt %48 : vector<1x128xf32>
    %50 = vector.broadcast %49 : vector<1x128xf32> to vector<16x128xf32>
    %51 = arith.mulf %46, %50 : vector<16x128xf32>
    %cst_21 = arith.constant 0.000000e+00 : f32
    %52 = vector.broadcast %cst_21 : f32 to vector<16x128xf32>
    %53 = arith.cmpf oge, %51, %52 : vector<16x128xf32>
    %cst_22 = arith.constant 0.00999999977 : f32
    %54 = vector.broadcast %cst_22 : f32 to vector<16x128xf32>
    %55 = arith.mulf %54, %51 : vector<16x128xf32>
    %56 = arith.select %53, %51, %55 : vector<16x128xi1>, vector<16x128xf32>
    %cst_23 = arith.constant 0.000000e+00 : f32
    %57 = vector.broadcast %cst_23 : f32 to vector<1x128xf32>
    %58 = vector.extract_strided_slice %56 {offsets = [0, 0], sizes = [15, 128], strides = [1, 1]} : vector<16x128xf32> to vector<15x128xf32>
    %59 = tpu.concatenate %57, %58 in 0 : vector<1x128xf32>, vector<15x128xf32> -> vector<16x128xf32>
    %60 = vector.extract_strided_slice %56 {offsets = [1, 0], sizes = [15, 128], strides = [1, 1]} : vector<16x128xf32> to vector<15x128xf32>
    %61 = tpu.concatenate %60, %57 in 0 : vector<15x128xf32>, vector<1x128xf32> -> vector<16x128xf32>
    %c0_24 = arith.constant 0 : index
    %c0_25 = arith.constant 0 : index
    %c0_26 = arith.constant 0 : index
    %62 = vector.load %arg3[%c0_24, %c0_25, %c0_26] : memref<3x128x128xf32, #tpu.memory_space<vmem>>, vector<1x128x128xf32>
    %63 = vector.shape_cast %62 : vector<1x128x128xf32> to vector<128x128xf32>
    %cst_27 = arith.constant dense<0.000000e+00> : vector<16x128xf32>
    %64 = tpu.matmul %59, %63, %cst_27 {dimension_numbers = #tpu.dot_dimension_numbers<[1], [0], [0], [1], [0, 0, 1, 1], [], []>} : vector<16x128xf32>, vector<128x128xf32>, vector<16x128xf32> -> vector<16x128xf32>
    %c1_28 = arith.constant 1 : index
    %c0_29 = arith.constant 0 : index
    %c0_30 = arith.constant 0 : index
    %65 = vector.load %arg3[%c1_28, %c0_29, %c0_30] : memref<3x128x128xf32, #tpu.memory_space<vmem>>, vector<1x128x128xf32>
    %66 = vector.shape_cast %65 : vector<1x128x128xf32> to vector<128x128xf32>
    %cst_31 = arith.constant dense<0.000000e+00> : vector<16x128xf32>
    %67 = tpu.matmul %56, %66, %cst_31 {dimension_numbers = #tpu.dot_dimension_numbers<[1], [0], [0], [1], [0, 0, 1, 1], [], []>} : vector<16x128xf32>, vector<128x128xf32>, vector<16x128xf32> -> vector<16x128xf32>
    %68 = arith.addf %64, %67 : vector<16x128xf32>
    %c2_32 = arith.constant 2 : index
    %c0_33 = arith.constant 0 : index
    %c0_34 = arith.constant 0 : index
    %69 = vector.load %arg3[%c2_32, %c0_33, %c0_34] : memref<3x128x128xf32, #tpu.memory_space<vmem>>, vector<1x128x128xf32>
    %70 = vector.shape_cast %69 : vector<1x128x128xf32> to vector<128x128xf32>
    %cst_35 = arith.constant dense<0.000000e+00> : vector<16x128xf32>
    %71 = tpu.matmul %61, %70, %cst_35 {dimension_numbers = #tpu.dot_dimension_numbers<[1], [0], [0], [1], [0, 0, 1, 1], [], []>} : vector<16x128xf32>, vector<128x128xf32>, vector<16x128xf32> -> vector<16x128xf32>
    %72 = arith.addf %68, %71 : vector<16x128xf32>
    %cst_36 = arith.constant dense<0.000000e+00> : vector<128xf32>
    %73 = vector.multi_reduction <add>, %72, %cst_36 [0] : vector<16x128xf32> to vector<128xf32>
    %74 = vector.shape_cast %73 : vector<128xf32> to vector<1x128xf32>
    %c8_i32_37 = arith.constant 8 : i32
    %75 = tpu.dynamic_rotate %74 by %c8_i32_37 dim 1 : vector<1x128xf32>, i32 -> vector<1x128xf32>
    %76 = arith.addf %74, %75 : vector<1x128xf32>
    %c16_i32_38 = arith.constant 16 : i32
    %77 = tpu.dynamic_rotate %76 by %c16_i32_38 dim 1 : vector<1x128xf32>, i32 -> vector<1x128xf32>
    %78 = arith.addf %76, %77 : vector<1x128xf32>
    %c32_i32_39 = arith.constant 32 : i32
    %79 = tpu.dynamic_rotate %78 by %c32_i32_39 dim 1 : vector<1x128xf32>, i32 -> vector<1x128xf32>
    %80 = arith.addf %78, %79 : vector<1x128xf32>
    %c64_i32_40 = arith.constant 64 : i32
    %81 = tpu.dynamic_rotate %80 by %c64_i32_40 dim 1 : vector<1x128xf32>, i32 -> vector<1x128xf32>
    %82 = arith.addf %80, %81 : vector<1x128xf32>
    %83 = arith.mulf %72, %72 : vector<16x128xf32>
    %cst_41 = arith.constant dense<0.000000e+00> : vector<128xf32>
    %84 = vector.multi_reduction <add>, %83, %cst_41 [0] : vector<16x128xf32> to vector<128xf32>
    %85 = vector.shape_cast %84 : vector<128xf32> to vector<1x128xf32>
    %c8_i32_42 = arith.constant 8 : i32
    %86 = tpu.dynamic_rotate %85 by %c8_i32_42 dim 1 : vector<1x128xf32>, i32 -> vector<1x128xf32>
    %87 = arith.addf %85, %86 : vector<1x128xf32>
    %c16_i32_43 = arith.constant 16 : i32
    %88 = tpu.dynamic_rotate %87 by %c16_i32_43 dim 1 : vector<1x128xf32>, i32 -> vector<1x128xf32>
    %89 = arith.addf %87, %88 : vector<1x128xf32>
    %c32_i32_44 = arith.constant 32 : i32
    %90 = tpu.dynamic_rotate %89 by %c32_i32_44 dim 1 : vector<1x128xf32>, i32 -> vector<1x128xf32>
    %91 = arith.addf %89, %90 : vector<1x128xf32>
    %c64_i32_45 = arith.constant 64 : i32
    %92 = tpu.dynamic_rotate %91 by %c64_i32_45 dim 1 : vector<1x128xf32>, i32 -> vector<1x128xf32>
    %93 = arith.addf %91, %92 : vector<1x128xf32>
    %cst_46 = arith.constant 3.906250e-03 : f32
    %94 = vector.broadcast %cst_46 : f32 to vector<1x128xf32>
    %95 = arith.mulf %82, %94 : vector<1x128xf32>
    %cst_47 = arith.constant 3.906250e-03 : f32
    %96 = vector.broadcast %cst_47 : f32 to vector<1x128xf32>
    %97 = arith.mulf %93, %96 : vector<1x128xf32>
    %98 = arith.mulf %95, %95 : vector<1x128xf32>
    %99 = arith.subf %97, %98 : vector<1x128xf32>
    %100 = vector.broadcast %95 : vector<1x128xf32> to vector<16x128xf32>
    %101 = arith.subf %72, %100 : vector<16x128xf32>
    %cst_48 = arith.constant 9.99999974E-6 : f32
    %102 = vector.broadcast %cst_48 : f32 to vector<1x128xf32>
    %103 = arith.addf %99, %102 : vector<1x128xf32>
    %104 = math.rsqrt %103 : vector<1x128xf32>
    %105 = vector.broadcast %104 : vector<1x128xf32> to vector<16x128xf32>
    %106 = arith.mulf %101, %105 : vector<16x128xf32>
    %cst_49 = arith.constant 0.000000e+00 : f32
    %107 = vector.broadcast %cst_49 : f32 to vector<16x128xf32>
    %108 = arith.cmpf oge, %106, %107 : vector<16x128xf32>
    %cst_50 = arith.constant 0.00999999977 : f32
    %109 = vector.broadcast %cst_50 : f32 to vector<16x128xf32>
    %110 = arith.mulf %109, %106 : vector<16x128xf32>
    %111 = arith.select %108, %106, %110 : vector<16x128xi1>, vector<16x128xf32>
    %c0_51 = arith.constant 0 : index
    %c0_52 = arith.constant 0 : index
    %c0_53 = arith.constant 0 : index
    %112 = vector.load %arg4[%c0_51, %c0_52, %c0_53] : memref<1x16x128xf32, #tpu.memory_space<vmem>>, vector<1x16x128xf32>
    %113 = vector.shape_cast %112 : vector<1x16x128xf32> to vector<16x128xf32>
    %114 = vector.shape_cast %111 : vector<16x128xf32> to vector<1x16x128xf32>
    tpu.vector_store %arg4[%c0_51, %c0_52, %c0_53], %114 {strides = array<i32>} : memref<1x16x128xf32, #tpu.memory_space<vmem>>, vector<1x16x128xf32>,
    return
  }
  func.func @transform_0(%arg0: i32) -> (i32, i32, i32) {
    %c0_i32 = arith.constant 0 : i32
    %c0_i32_0 = arith.constant 0 : i32
    %c0_i32_1 = arith.constant 0 : i32
    return %arg0, %c0_i32, %c0_i32_0 : i32, i32, i32
  }
  func.func @transform_1(%arg0: i32) -> (i32, i32, i32) {
    %c0_i32 = arith.constant 0 : i32
    %c0_i32_0 = arith.constant 0 : i32
    %c0_i32_1 = arith.constant 0 : i32
    %c0_i32_2 = arith.constant 0 : i32
    return %c0_i32, %c0_i32_0, %c0_i32_1 : i32, i32, i32
  }
  func.func @transform_2(%arg0: i32) -> (i32, i32, i32) {
    %c0_i32 = arith.constant 0 : i32
    %c0_i32_0 = arith.constant 0 : i32
    %c0_i32_1 = arith.constant 0 : i32
    %c0_i32_2 = arith.constant 0 : i32
    return %c0_i32, %c0_i32_0, %c0_i32_1 : i32, i32, i32
  }
  func.func @transform_3(%arg0: i32) -> (i32, i32, i32) {
    %c0_i32 = arith.constant 0 : i32
    %c0_i32_0 = arith.constant 0 : i32
    %c0_i32_1 = arith.constant 0 : i32
    return %arg0, %c0_i32, %c0_i32_0 : i32, i32, i32
  }
}

</mosaic_0001>

<bundles_post_ra>
// kernel: tpu_custom_call.1
= control target key start
LH: loop header
LB: loop body
LE: loop exit
PB: predicated region body
PF: predicated region fallthrough
CT: control target
= control target key end

     0   :  { %8 = vsyncpa [#allocation3], 0  ;;  %s2023_s0 = inlined_call_operand.hbm [shape: f32[2,16,64], index: 0, kind: input, shape index: {}]   ;;  %s2024_s1 = inlined_call_operand.hbm [shape: f32[3,64,128], index: 1, kind: input, shape index: {}]   ;;  %s2025_s2 = inlined_call_operand.hbm [shape: f32[3,128,128], index: 2, kind: input, shape index: {}]   ;;  %s2026_s3 = inlined_call_operand.hbm [shape: f32[2,16,128], index: 3, kind: output, shape index: {}]  }
   0x1   :  { %10 = vsyncpa [#allocation3 + $0x1], 0 }
   0x2   :  { %11 = vsyncpa [#allocation6], 0 }
   0x3   :  { %12 = vsyncpa [#allocation4], 0 }
   0x4   :  { %14 = vsyncpa [#allocation4 + $0x1], 0  ;;  %s1723_s12 = smov 0   ;;  %s1725_s13 = smov 0  }
   0x5   :  { %s1727_s14 = smov 0   ;;  %s1729_s15 = smov 0  }
   0x6 LB: > { %s1744_s16 = sadd.s32 4294967295, %s1690_s15   ;;  %s1029_s17 = sadd.s32 4294967294, %s1690_s15   ;;  %s1690_s15 = sphi %s1729_s15, %s2046_s15   ;;  %s1686_s14 = sphi %s1727_s14, %s2045_s14   ;;  %s1682_s13 = sphi %s1725_s13, %s2044_s13   ;;  %s1678_s12 = sphi %s1723_s12, %s2043_s12  }
   0x7   : > { %p40_p0 = scmp.ne.s32.totalorder %s1682_s13, %s1678_s12  ;;  %p2027_p1 = scmp.eq.s32.totalorder %s1744_s16, 0 }
   0x8   : > { %p112_p3 = scmp.eq.s32.totalorder %s1029_s17, 1  ;;  %p1030_p5 = scmp.ge.s32.totalorder %s1690_s15, 1 }
   0x9   : > { %p1753_p4 = por %p2027_p1, %p40_p0  ;;  %p119_p7 = scmp.lt.s32.totalorder %s1690_s15, 3 }
   0xa   : > { %p1758_p6 = por %p112_p3, %p40_p0  ;;  %s1692_s21 = smov [#allocation5]  }
   0xb   : > { %s2030_s18 = scalar_select %p1753_p4, 1, 0 }
   0xc   : > { %s2031_s19 = scalar_select %p1758_p6, 1, 0 }
   0xd   : > { %p1763_p8 = pnand %p1030_p5, %p119_p7  ;;  %s131_s22 = sshll.u32 %s1692_s21, 4  ;;  %s1767_s22 = int_to_ptr.vmem [resolvable:$true] %s131_s22 }
   0xe   : > { %s1693_s24 = smov [#allocation7]   ;;  %s1534_s28 = scalar_lea.hbm %s2024_s1, 3072 }
   0xf   : > { %p1468_p9 = pneg %p1763_p8  ;;  %s144_s25 = sshll.u32 %s1693_s24, 4  ;;  %s1778_s25 = int_to_ptr.vmem [resolvable:$true] %s144_s25 }
  0x10   : > { %p1535_p12 = scmp.ne.s32.totalorder %s2024_s1, %s1534_s28  ;;  %p1541_p5 = scmp.lt.u32.totalorder %s1534_s28, %s2024_s1 }
  0x11   : > { %p1774_p11 = pnand %p1468_p9, %p2027_p1 }
  0x13   : > { %p1536_p13 = pneg %p1774_p11 }
  0x15   : > { %p1537_p0 = pnand %p1536_p13, %p1535_p12 }
  0x17   : > { %p1538_p3 = pneg %p1537_p0 }
  0x19   : > { %p1543_p7 = pnand %p1541_p5, %p1538_p3 }
  0x1b   : > { %1546 = shalt.err (!%p1543_p7)
}
  0x1c   : > { %s1547_s6 = scalar_lea.vmem %s1767_s22, 3072  ;;  %p1555_p2 = scmp.lt.s32.totalorder %s1767_s22, %s1767_s22 }
  0x1d   : > { %p1548_p9 = scmp.ne.s32.totalorder %s1767_s22, %s1547_s6  ;;  %p1556_p12 = scmp.lt.s32.totalorder %s1547_s6, %s1547_s6 }
  0x1f   : > { %p1550_p10 = pnand %p1548_p9, %p1536_p13  ;;  %p1557_p0 = por %p1556_p12, %p1555_p2 }
  0x21   : > { %p1551_p1 = pneg %p1550_p10 }
  0x23   : > { %p1558_p6 = pnand %p1557_p0, %p1551_p1 }
  0x25   : > { %1561 = shalt.err (!%p1558_p6)
}
  0x26   : > { %s1694_s7 = smov 128   ;;  %s1695_s8 = smov 8  }
  0x27   : > { %1471 = dma.hbm_to_vmem [thread:$0]  (!%p1774_p11), %s2024_s1, 3072, %s1767_s22, [#allocation6], %s1694_s7, %s1694_s7, %s1695_s8  }
  0x28   : > { %s1562_s21 = scalar_lea.hbm %s2025_s2, 6144 }
  0x29   : > { %p1563_p1 = scmp.ne.s32.totalorder %s2025_s2, %s1562_s21  ;;  %p1569_p10 = scmp.lt.u32.totalorder %s1562_s21, %s2025_s2 }
  0x2b   : > { %p1565_p2 = pnand %p1563_p1, %p1536_p13 }
  0x2d   : > { %p1566_p6 = pneg %p1565_p2 }
  0x2f   : > { %p1571_p3 = pnand %p1569_p10, %p1566_p6 }
  0x31   : > { %1574 = shalt.err (!%p1571_p3)
}
  0x32   : > { %s1575_s22 = scalar_lea.vmem %s1778_s25, 6144  ;;  %p1583_p12 = scmp.lt.s32.totalorder %s1778_s25, %s1778_s25 }
  0x33   : > { %p1576_p5 = scmp.ne.s32.totalorder %s1778_s25, %s1575_s22  ;;  %p1584_p0 = scmp.lt.s32.totalorder %s1575_s22, %s1575_s22 }
  0x35   : > { %p1578_p7 = pnand %p1576_p5, %p1536_p13  ;;  %p1585_p1 = por %p1584_p0, %p1583_p12 }
  0x37   : > { %p1579_p9 = pneg %p1578_p7 }
  0x39   : > { %p1586_p2 = pnand %p1585_p1, %p1579_p9 }
  0x3b   : > { %1589 = shalt.err (!%p1586_p2)
}
  0x3c   : > { %1474 = dma.hbm_to_vmem [thread:$0]  (!%p1774_p11), %s2025_s2, 6144, %s1778_s25, [#allocation6], %s1694_s7, %s1694_s7, %s1695_s8  }
  0x3d   : > { %s1839_s23 = sadd.s32 1, %s1690_s15   ;;  %s27_s4 = sadd.s32 1, %s1686_s14 }
  0x3e   : > { %s24_s5 = ssub.s32 %s1690_s15, %s1839_s23  ;;  %p34_p13 = scmp.ne.s32.totalorder %s1686_s14, %s1682_s13 }
  0x3f   : > { %p25_p6 = scmp.eq.s32.totalorder %s24_s5, 0  ;;  %p35_p10 = scmp.eq.s32.totalorder %s1690_s15, 0 }
  0x40   : > { %p2034_p3 = scmp.eq.s32.totalorder %s1744_s16, 1  ;;  %p1485_p7 = scmp.lt.s32.totalorder %s1690_s15, 2 }
  0x41   : > { %s1855_s9 = scalar_select %p25_p6, %s1686_s14, %s27_s4  }
  0x42   : > { %p1849_p5 = por %p2034_p3, %p34_p13  ;;  %p36_p9 = por %p35_p10, %p34_p13 }
  0x43   : > { %s158_s10 = sand.u32 1, %s1686_s14   ;;  %s1056_s25 = sshll.u32 %s1690_s15, 8 }
  0x44   : > { %s2035_s6 = scalar_select %p1849_p5, 1, 0 }
  0x45   : > { %s1034_s11 = sshll.u32 %s158_s10, 4  ;;  %s1862_s24 = scalar_lea.hbm %s2023_s0, %s1056_s25 }
  0x46   : > { %s162_s26 = scalar_lea.vmem [#allocation2], %s1034_s11  ;;  %p1866_p11 = pnand %p1485_p7, %p36_p9 }
  0x47   : > { %s169_s27 = sshll.u32 %s162_s26, 4  ;;  %s1870_s22 = scalar_lea.sflag [#allocation3], %s158_s10  ;;  %s1864_s27 = int_to_ptr.vmem [resolvable:$true] %s169_s27 }
  0x48   : > { %s1590_s29 = scalar_lea.hbm %s1862_s24, 256  ;;  %p1592_p0 = pneg %p1866_p11 }
  0x49   : > { %p1591_p12 = scmp.ne.s32.totalorder %s1862_s24, %s1590_s29  ;;  %s1595_s5 = scalar_lea.hbm %s2023_s0, 512 }
  0x4a   : > { %p1596_p13 = scmp.lt.u32.totalorder %s1862_s24, %s2023_s0  ;;  %p1597_p6 = scmp.lt.u32.totalorder %s1595_s5, %s1590_s29 }
  0x4b   : > { %p1593_p1 = pnand %p1592_p0, %p1591_p12  ;;  %p1599_p3 = scmp.lt.u32.totalorder %s1590_s29, %s1862_s24 }
  0x4c   : > { %p1598_p10 = por %p1597_p6, %p1596_p13 }
  0x4d   : > { %p1594_p2 = pneg %p1593_p1 }
  0x4e   : > { %p1600_p7 = por %p1599_p3, %p1598_p10 }
  0x50   : > { %p1601_p9 = pnand %p1600_p7, %p1594_p2 }
  0x52   : > { %1604 = shalt.err (!%p1601_p9)
}
  0x53   : > { %s1605_s10 = scalar_lea.vmem %s1864_s27, 256  ;;  %s1696_s17 = smov [#allocation2]  }
  0x54   : > { %p1606_p12 = scmp.ne.s32.totalorder %s1864_s27, %s1605_s10  ;;  %s1610_s21 = sshll.u32 %s1696_s17, 4  ;;  %s1611_s21 = int_to_ptr.vmem [resolvable:$false] %s1610_s21 }
  0x55   : > { %s1612_s26 = scalar_lea.vmem %s1611_s21, 512  ;;  %p1613_p4 = scmp.lt.s32.totalorder %s1864_s27, %s1611_s21 }
  0x56   : > { %p1608_p1 = pnand %p1606_p12, %p1592_p0  ;;  %p1614_p13 = scmp.lt.s32.totalorder %s1612_s26, %s1605_s10 }
  0x58   : > { %p1609_p5 = pneg %p1608_p1  ;;  %p1615_p6 = por %p1614_p13, %p1613_p4 }
  0x5a   : > { %p1616_p10 = pnand %p1615_p6, %p1609_p5 }
  0x5c   : > { %1619 = shalt.err (!%p1616_p10)
}
  0x5d   : > { %1478 = dma.hbm_to_vmem [thread:$0]  (!%p1866_p11), %s1862_s24, 256, %s1864_s27, %s1870_s22, %s1694_s7, %s1694_s7, %s1695_s8  }
  0x5e   : > { %181 = sbr.rel (%p1763_p8) target bundleno = 1652 (0x674), region = 32  ;;  %s1904_s29 = sand.u32 (!%p1763_p8), 1, %s1682_s13  }
  0x5f   : > { %s1038_s30 = sshll.u32 (!%p1763_p8), %s1904_s29, 4  ;;  %s184_s4 = scalar_lea.sflag (!%p1763_p8), [#allocation3], %s1904_s29 }
  0x60   : > { %s1910_s28 = scalar_lea.vmem (!%p1763_p8), [#allocation2], %s1038_s30  ;;  %p2037_p4 = scmp.ne.s32.totalorder (!%p1763_p8), %s2030_s18, 0 }
  0x65   : > { %1665 = dma.done.wait (%p2037_p4), %s184_s4, 256  }
  0x66   : > { %1667 = vsyncadd (%p2037_p4), %s184_s4, 4294967040  ;;  %p2038_p5 = scmp.eq.s32.totalorder %s1744_s16, 0 }
  0x68   : > { %1669 = dma.done.wait (%p2038_p5), [#allocation6], 9216   ;;  %p2039_p8 = pmov %p2038_p5 }
  0x69   : > { %v243_v0 = vld [vmem:[#allocation5 + $0x40] sm:$0xff]  ;;  %v244_v1 = vld [vmem:[#allocation5 + $0x48] sm:$0xff]  ;;  %v245_v2 = vld [vmem:[#allocation5 + $0x50] sm:$0xff]  ;;  %vm251_vm0 = vcmask 523264   ;;  %vm222_vm1 = vcmask 1040384   ;;  %vm228_vm2 = vcmask 1046528  }
  0x6a   : > { %1671 = vsyncadd (%p2039_p8), [#allocation6], 4294958080  ;;  %v1304_v3 = vpack.c.bf16 %v244_v1, %v243_v0  ;;  %v246_v4 = vld [vmem:[#allocation5 + $0x58] sm:$0xff]  ;;  %v247_v6 = vld [vmem:[#allocation5 + $0x60] sm:$0xff]  ;;  %s1697_s18 = smov 8   ;;  %s1698_s20 = smov 16  }
  0x6b   : > { %v1308_v5 = vpack.c.bf16 %v246_v4, %v245_v2  ;;  %v248_v7 = vld [vmem:[#allocation5 + $0x68] sm:$0xff]  ;;  %v218_v8 = vld [vmem:[%s1910_s28] sm:$0xff]  ;;  %v250_v11 = vld [vmem:[#allocation5 + $0x78] sm:$0xff]  ;;  %s1699_s7 = smov 32   ;;  %s1700_s8 = smov 64  }
  0x6c   : > { %1305 = vmatprep.subr.bf16.mxu0 %v1304_v3  ;;  %1158 = vmatprep.mubr.msk.f32.mxu0 %vm251_vm0, %v218_v8  ;;  %v1312_v9 = vpack.c.bf16 %v248_v7, %v247_v6  ;;  %v249_v10 = vld [vmem:[#allocation5 + $0x70] sm:$0xff]  ;;  %v234_v13 = vld [vmem:[#allocation5] sm:$0xff]  ;;  %v235_v14 = vld [vmem:[#allocation5 + $0x8] sm:$0xff]  ;;  %v223_v15 = vrot.slane %v218_v8, 7  ;;  %v229_v31 = vrot.slane %v218_v8, 1  ;;  %s1057_s24 = sshll.u32 %s1744_s16, 8 }
  0x6d   : > { %1307 = vmatpush3.bf16.msra.mxu0 %v1304_v3  ;;  %v1316_v12 = vpack.c.bf16 %v250_v11, %v249_v10  ;;  %v1320_v16 = vpack.c.bf16 %v235_v14, %v234_v13  ;;  %v236_v17 = vld [vmem:[#allocation5 + $0x10] sm:$0xff]  ;;  %v237_v18 = vld [vmem:[#allocation5 + $0x18] sm:$0xff]  ;;  %v238_v22 = vld [vmem:[#allocation5 + $0x20] sm:$0xff]  ;;  %s217_s27 = scalar_lea.vmem [#allocation8], %s1038_s30  ;;  %s1976_s25 = scalar_lea.hbm %s2026_s3, %s1057_s24 }
  0x6e   : > { %1309 = vmatprep.subr.bf16.mxu0 %v1308_v5  ;;  %v219_v19 = vld [vmem:[%s1910_s28 + $0x8] sm:$0xff]  ;;  %v1324_v20 = vpack.c.bf16 %v237_v18, %v236_v17  ;;  %v227_v21 = vsel %vm222_vm1, 0.0, %v223_v15  ;;  %v240_v25 = vld [vmem:[#allocation5 + $0x30] sm:$0xff]  ;;  %v412_v28 = vld [vmem:[#allocation5 + $0x80] sm:$0xff]  ;;  %s937_s22 = sshll.u32 %s217_s27, 4  ;;  %s924_s16 = scalar_lea.sflag [#allocation4], %s1904_s29  ;;  %s1978_s22 = int_to_ptr.vmem [resolvable:$true] %s937_s22 }
  0x6f   : > { %v239_v23 = vld [vmem:[#allocation5 + $0x28] sm:$0xff]  ;;  %v241_v26 = vld [vmem:[#allocation5 + $0x38] sm:$0xff]  ;;  %v224_v30 = vrot.slane %v219_v19, 7  ;;  %v230_v32 = vrot.slane %v219_v19, 1  ;;  %v414_v34 = vld [vmem:[#allocation5 + $0x90] sm:$0xff]  ;;  %s1620_s10 = scalar_lea.vmem %s1978_s22, 256 }
  0x70   : > { %v1328_v24 = vpack.c.bf16 %v239_v23, %v238_v22  ;;  %v1332_v27 = vpack.c.bf16 %v241_v26, %v240_v25  ;;  %v413_v29 = vld [vmem:[#allocation5 + $0x88] sm:$0xff]  ;;  %v415_v35 = vld [vmem:[#allocation5 + $0x98] sm:$0xff]  ;;  %v416_v39 = vld [vmem:[#allocation5 + $0xa0] sm:$0xff]  ;;  %p1621_p11 = scmp.ne.s32.totalorder %s1978_s22, %s1620_s10  ;;  %p2040_p0 = scmp.ne.s32.totalorder %s2035_s6, 0 }
  0x71   : > { %1311 = vmatpush3.bf16.msra.mxu0 %v1308_v5  ;;  %v1336_v33 = vpack.c.bf16 %v413_v29, %v412_v28  ;;  %v225_v36 = vsel %vm222_vm1, %v223_v15, %v224_v30  ;;  %v1340_v37 = vpack.c.bf16 %v415_v35, %v414_v34  ;;  %v231_v38 = vsel %vm228_vm2, %v229_v31, %v230_v32  ;;  %v417_v40 = vld [vmem:[#allocation5 + $0xa8] sm:$0xff]  ;;  %v418_v42 = vld [vmem:[#allocation5 + $0xb0] sm:$0xff]  ;;  %v419_v43 = vld [vmem:[#allocation5 + $0xb8] sm:$0xff]  ;;  %s1701_s17 = smov [#allocation8]  }
  0x72   : > { %1313 = vmatprep.subr.bf16.mxu0 %v1312_v9  ;;  %v1344_v41 = vpack.c.bf16 %v417_v40, %v416_v39  ;;  %v1348_v44 = vpack.c.bf16 %v419_v43, %v418_v42  ;;  %v233_v45 = vsel %vm228_vm2, %v230_v32, 0.0  ;;  %v597_v4 = vld [vmem:[#allocation7 + $0x80] sm:$0xff]  ;;  %v598_v5 = vld [vmem:[#allocation7 + $0x88] sm:$0xff]  ;;  %v599_v14 = vld [vmem:[#allocation7 + $0x90] sm:$0xff]  ;;  %p1622_p2 = pnand %p1621_p11, %p2040_p0  ;;  %s1624_s21 = sshll.u32 %s1701_s17, 4  ;;  %s1625_s21 = int_to_ptr.vmem [resolvable:$false] %s1624_s21 }
  0x73   : > { %v1352_v6 = vpack.c.bf16 %v598_v5, %v597_v4  ;;  %v580_v11 = vld [vmem:[#allocation7] sm:$0xff]  ;;  %v600_v15 = vld [vmem:[#allocation7 + $0x98] sm:$0xff]  ;;  %v582_v17 = vld [vmem:[#allocation7 + $0x10] sm:$0xff]  ;;  %s1626_s26 = scalar_lea.vmem %s1625_s21, 512  ;;  %p1627_p7 = scmp.lt.s32.totalorder %s1978_s22, %s1625_s21 }
  0x74   : > { %v583_v18 = vld [vmem:[#allocation7 + $0x18] sm:$0xff]  ;;  %v584_v23 = vld [vmem:[#allocation7 + $0x20] sm:$0xff]  ;;  %v603_v26 = vld [vmem:[#allocation7 + $0xb0] sm:$0xff]  ;;  %p1623_p3 = pneg %p1622_p2  ;;  %p1628_p9 = scmp.lt.s32.totalorder %s1626_s26, %s1620_s10 }
  0x75   : > { %1315 = vmatpush3.bf16.msra.mxu0 %v1312_v9  ;;  %v586_v29 = vld [vmem:[#allocation7 + $0x30] sm:$0xff]  ;;  %v587_v30 = vld [vmem:[#allocation7 + $0x38] sm:$0xff]  ;;  %v605_v34 = vld [vmem:[#allocation7 + $0xc0] sm:$0xff] }
  0x76   : > { %1317 = vmatprep.subr.bf16.mxu0 %v1316_v12  ;;  %v1396_v32 = vpack.c.bf16 %v587_v30, %v586_v29  ;;  %v606_v35 = vld [vmem:[#allocation7 + $0xc8] sm:$0xff]  ;;  %v607_v39 = vld [vmem:[#allocation7 + $0xd0] sm:$0xff]  ;;  %v608_v40 = vld [vmem:[#allocation7 + $0xd8] sm:$0xff]  ;;  %p1629_p12 = por %p1628_p9, %p1627_p7 }
  0x77   : > { %v1372_v43 = vpack.c.bf16 %v608_v40, %v607_v39  ;;  %vm1048_vm5 = vmneg %vm222_vm1  ;;  %v774_v40 = vld [vmem:[#allocation7 + $0x150] sm:$0xff] }
  0x78   : > { %p1630_p1 = pnand %p1629_p12, %p1623_p3 }
  0x79   : > { %1319 = vmatpush3.bf16.msra.mxu0 %v1316_v12  ;;  %v581_v12 = vld [vmem:[#allocation7 + $0x8] sm:$0xff] }
  0x7a   : > { %1321 = vmatprep.subr.bf16.mxu0 %v1320_v16  ;;  %v1384_v13 = vpack.c.bf16 %v581_v12, %v580_v11 }
  0x7c   : > { %1159 = vmatmul.mubr.msk.f32.vlgmr.msra.gmra.mrb[0].mxu0 %vm251_vm0, %v219_v19  ;;  %1385 = vmatprep.subr.bf16.mxu1 %v1384_v13  ;;  %v1388_v19 = vpack.c.bf16 %v583_v18, %v582_v17 }
  0x7d   : > { %1323 = vmatpush3.bf16.msra.mxu0 %v1320_v16  ;;  %1177 = vmatprep.mubr.msk.f32.mxu0 %vm251_vm0, %v227_v21  ;;  %v1356_v16 = vpack.c.bf16 %v600_v15, %v599_v14  ;;  %v602_v21 = vld [vmem:[#allocation7 + $0xa8] sm:$0xff] }
  0x7e   : > { %1325 = vmatprep.subr.bf16.mxu0 %v1324_v20  ;;  %1387 = vmatpush3.bf16.msra.mxu1 %v1384_v13 }
  0x7f   : > { %1389 = vmatprep.subr.bf16.mxu1 %v1388_v19 }
  0x81   : > { %1327 = vmatpush3.bf16.msra.mxu0 %v1324_v20  ;;  %v601_v20 = vld [vmem:[#allocation7 + $0xa0] sm:$0xff] }
  0x82   : > { %1329 = vmatprep.subr.bf16.mxu0 %v1328_v24  ;;  %1391 = vmatpush3.bf16.msra.mxu1 %v1388_v19  ;;  %v1360_v22 = vpack.c.bf16 %v602_v21, %v601_v20 }
  0x85   : > { %1331 = vmatpush3.bf16.msra.mxu0 %v1328_v24  ;;  %v585_v24 = vld [vmem:[#allocation7 + $0x28] sm:$0xff] }
  0x86   : > { %1333 = vmatprep.subr.bf16.mxu0 %v1332_v27  ;;  %v1392_v25 = vpack.c.bf16 %v585_v24, %v584_v23  ;;  %v767_v23 = vld [vmem:[#allocation7 + $0x118] sm:$0xff] }
  0x88   : > { %1393 = vmatprep.subr.bf16.mxu1 %v1392_v25 }
  0x89   : > { %1335 = vmatpush3.bf16.msra.mxu0 %v1332_v27  ;;  %v604_v27 = vld [vmem:[#allocation7 + $0xb8] sm:$0xff]  ;;  %1395 = vmatpush3.bf16.msra.mxu1 %v1392_v25 }
  0x8a   : > { %1337 = vmatprep.subr.bf16.mxu0 %v1336_v33  ;;  %v1364_v28 = vpack.c.bf16 %v604_v27, %v603_v26  ;;  %1397 = vmatprep.subr.bf16.mxu1 %v1396_v32 }
  0x8c   : > { %1178 = vmatmul.mubr.msk.f32.vlgmr.msra.gmra.mrb[0].mxu0 %vm251_vm0, %v225_v36  ;;  %v588_v36 = vld [vmem:[#allocation7 + $0x40] sm:$0xff] }
  0x8d   : > { %1339 = vmatpush3.bf16.msra.mxu0 %v1336_v33  ;;  %1196 = vmatprep.mubr.msk.f32.mxu0 %vm251_vm0, %v231_v38  ;;  %v589_v38 = vld [vmem:[#allocation7 + $0x48] sm:$0xff] }
  0x8e   : > { %1341 = vmatprep.subr.bf16.mxu0 %v1340_v37  ;;  %1399 = vmatpush3.bf16.msra.mxu1 %v1396_v32  ;;  %v1400_v42 = vpack.c.bf16 %v589_v38, %v588_v36  ;;  %v769_v32 = vld [vmem:[#allocation7 + $0x128] sm:$0xff] }
  0x8f   : > { %v773_v38 = vld [vmem:[#allocation7 + $0x148] sm:$0xff] }
  0x90   : > { %1401 = vmatprep.subr.bf16.mxu1 %v1400_v42 }
  0x91   : > { %1343 = vmatpush3.bf16.msra.mxu0 %v1340_v37  ;;  %v1368_v37 = vpack.c.bf16 %v606_v35, %v605_v34  ;;  %v770_v34 = vld [vmem:[#allocation7 + $0x130] sm:$0xff]  ;;  %v771_v35 = vld [vmem:[#allocation7 + $0x138] sm:$0xff] }
  0x92   : > { %1345 = vmatprep.subr.bf16.mxu0 %v1344_v41  ;;  %1403 = vmatpush3.bf16.msra.mxu1 %v1400_v42  ;;  %v1428_v36 = vpack.c.bf16 %v771_v35, %v770_v34 }
  0x95   : > { %1347 = vmatpush3.bf16.msra.mxu0 %v1344_v41 }
  0x96   : > { %1349 = vmatprep.subr.bf16.mxu0 %v1348_v44 }
  0x99   : > { %1351 = vmatpush3.bf16.msra.mxu0 %v1348_v44  ;;  %v590_v44 = vld [vmem:[#allocation7 + $0x50] sm:$0xff] }
  0x9a   : > { %1353 = vmatprep.subr.bf16.mxu0 %v1352_v6 }
  0x9c   : > { %1197 = vmatmul.mubr.msk.f32.vlgmr.msra.gmra.mrb[0].mxu0 %vm251_vm0, %v233_v45  ;;  %v591_v45 = vld [vmem:[#allocation7 + $0x58] sm:$0xff] }
  0x9d   : > { %1355 = vmatpush3.bf16.msra.mxu0 %v1352_v6 }
  0x9e   : > { %1357 = vmatprep.subr.bf16.mxu0 %v1356_v16 }
  0xa1   : > { %1359 = vmatpush3.bf16.msra.mxu0 %v1356_v16 }
  0xa2   : > { %1361 = vmatprep.subr.bf16.mxu0 %v1360_v22 }
  0xa5   : > { %1363 = vmatpush3.bf16.msra.mxu0 %v1360_v22  ;;  %v766_v22 = vld [vmem:[#allocation7 + $0x110] sm:$0xff] }
  0xa6   : > { %1365 = vmatprep.subr.bf16.mxu0 %v1364_v28 }
  0xa9   : > { %1367 = vmatpush3.bf16.msra.mxu0 %v1364_v28 }
  0xaa   : > { %1369 = vmatprep.subr.bf16.mxu0 %v1368_v37 }
  0xad   : > { %1371 = vmatpush3.bf16.msra.mxu0 %v1368_v37  ;;  %v772_v37 = vld [vmem:[#allocation7 + $0x140] sm:$0xff] }
  0xae   : > { %1373 = vmatprep.subr.bf16.mxu0 %v1372_v43  ;;  %v1432_v39 = vpack.c.bf16 %v773_v38, %v772_v37 }
  0xb1   : > { %1375 = vmatpush3.bf16.msra.mxu0 %v1372_v43  ;;  %v776_v43 = vld [vmem:[#allocation7 + $0x160] sm:$0xff] }
 0x16f   : > { %v1932_v46 = vpop.f32.mrb[0].mxu0 }
 0x170   : > { %v522_v47 = vmul.f32 %v1932_v46, %v1932_v46  ;;  %v1936_v48 = vpop.f32.mrb[1].mxu0 }
 0x171   : > { %v502_v49 = vadd.f32 %v1932_v46, %v1936_v48  ;;  %v521_v50 = vmul.f32 %v1936_v48, %v1936_v48 }
 0x173   : > { %v503_v51 = vrot.slane %v502_v49, 4  ;;  %v523_v52 = vadd.f32 %v522_v47, %v521_v50  ;;  %v609_v47 = vld [vmem:[#allocation7 + $0xe0] sm:$0xff]  ;;  %v1404_v50 = vpack.c.bf16 %v591_v45, %v590_v44  ;;  %v777_v44 = vld [vmem:[#allocation7 + $0x168] sm:$0xff] }
 0x174   : > { %v1440_v45 = vpack.c.bf16 %v777_v44, %v776_v43 }
 0x175   : > { %v524_v53 = vrot.slane %v523_v52, 4  ;;  %v504_v54 = vadd.f32 %v503_v51, %v502_v49  ;;  %v610_v51 = vld [vmem:[#allocation7 + $0xe8] sm:$0xff]  ;;  %1405 = vmatprep.subr.bf16.mxu1 %v1404_v50 }
 0x176   : > { %1407 = vmatpush3.bf16.msra.mxu1 %v1404_v50 }
 0x177   : > { %v525_v55 = vadd.f32 %v524_v53, %v523_v52  ;;  %v505_v56 = vrot.slane %v504_v54, 2  ;;  %v592_v52 = vld [vmem:[#allocation7 + $0x60] sm:$0xff]  ;;  %v593_v53 = vld [vmem:[#allocation7 + $0x68] sm:$0xff] }
 0x179   : > { %v506_v57 = vadd.f32 %v505_v56, %v504_v54  ;;  %v526_v58 = vrot.slane %v525_v55, 2  ;;  %v1376_v54 = vpack.c.bf16 %v610_v51, %v609_v47  ;;  %v611_v56 = vld [vmem:[#allocation7 + $0xf0] sm:$0xff] }
 0x17a   : > { %v778_v47 = vld [vmem:[#allocation7 + $0x170] sm:$0xff] }
 0x17b   : > { %v507_v59 = vrot.slane %v506_v57, 1  ;;  %v527_v60 = vadd.f32 %v526_v58, %v525_v55  ;;  %v1408_v55 = vpack.c.bf16 %v593_v53, %v592_v52  ;;  %v594_v58 = vld [vmem:[#allocation7 + $0x70] sm:$0xff]  ;;  %1377 = vmatprep.subr.bf16.mxu0 %v1376_v54 }
 0x17c   : > { %1379 = vmatpush3.bf16.msra.mxu0 %v1376_v54 }
 0x17d   : > { %v508_v61 = vadd.f32 %v507_v59, %v506_v57  ;;  %v528_v62 = vrot.slane %v527_v60, 1  ;;  %v612_v57 = vld [vmem:[#allocation7 + $0xf8] sm:$0xff]  ;;  %1409 = vmatprep.subr.bf16.mxu1 %v1408_v55 }
 0x17e   : > { %v595_v59 = vld [vmem:[#allocation7 + $0x78] sm:$0xff]  ;;  %1411 = vmatpush3.bf16.msra.mxu1 %v1408_v55 }
 0x17f   : > { %509 = vrot.lane.b32.xlu0 %v508_v61, %s1697_s18  ;;  %v529_v63 = vadd.f32 %v528_v62, %v527_v60  ;;  %v1380_v60 = vpack.c.bf16 %v612_v57, %v611_v56  ;;  %v764_v62 = vld [vmem:[#allocation7 + $0x100] sm:$0xff] }
 0x181   : > { %1381 = vmatprep.subr.bf16.mxu0 %v1380_v60 }
 0x182   : > { %1383 = vmatpush3.bf16.msra.mxu0 %v1380_v60 }
 0x183   : > { %530 = vrot.lane.b32.xlu0 %v529_v63, %s1697_s18 }
 0x1f1   : > { %v510_v0 = vpop.permute.xlu0 %509 }
 0x1f2   : > { %v511_v1 = vadd.f32 %v510_v0, %v508_v61  ;;  %v1412_v61 = vpack.c.bf16 %v595_v59, %v594_v58 }
 0x1f4   : > { %512 = vrot.lane.b32.xlu1 %v511_v1, %s1698_s20  ;;  %1413 = vmatprep.subr.bf16.mxu1 %v1412_v61 }
 0x1f5   : > { %v531_v2 = vpop.permute.xlu0 %530  ;;  %1415 = vmatpush3.bf16.msra.mxu1 %v1412_v61 }
 0x1f6   : > { %v532_v3 = vadd.f32 %v531_v2, %v529_v63  ;;  %v765_v63 = vld [vmem:[#allocation7 + $0x108] sm:$0xff] }
 0x1f7   : > { %v1416_v0 = vpack.c.bf16 %v765_v63, %v764_v62 }
 0x1f8   : > { %533 = vrot.lane.b32.xlu1 %v532_v3, %s1698_s20 }
 0x1f9   : > { %1417 = vmatprep.subr.bf16.mxu1 %v1416_v0 }
 0x266   : > { %v513_v7 = vpop.permute.xlu1 %512 }
 0x267   : > { %v514_v8 = vadd.f32 %v513_v7, %v511_v1 }
 0x269   : > { %515 = vrot.lane.b32.xlu0 %v514_v8, %s1699_s7 }
 0x26a   : > { %v534_v9 = vpop.permute.xlu1 %533 }
 0x26b   : > { %v535_v10 = vadd.f32 %v534_v9, %v532_v3 }
 0x26d   : > { %536 = vrot.lane.b32.xlu1 %v535_v10, %s1699_s7 }
 0x2db   : > { %v516_v31 = vpop.permute.xlu0 %515 }
 0x2dc   : > { %v517_v33 = vadd.f32 %v516_v31, %v514_v8  ;;  %v546_v8 = vlaneseq  ;;  %v768_v31 = vld [vmem:[#allocation7 + $0x120] sm:$0xff] }
 0x2de   : > { %518 = vrot.lane.b32.xlu0 %v517_v33, %s1700_s8  ;;  %v547_v11 = vshrl.u32 %v546_v8, 7 }
 0x2df   : > { %v537_v41 = vpop.permute.xlu1 %536 }
 0x2e0   : > { %v538_v49 = vadd.f32 %v537_v41, %v535_v10  ;;  %v1950_v12 = vsub.s32 0, %v547_v11  ;;  %v775_v41 = vld [vmem:[#allocation7 + $0x158] sm:$0xff] }
 0x2e1   : > { %v1436_v42 = vpack.c.bf16 %v775_v41, %v774_v40 }
 0x2e2   : > { %539 = vrot.lane.b32.xlu1 %v538_v49, %s1700_s8 }
 0x350   : > { %v519_v1 = vpop.permute.xlu0 %518 }
 0x351   : > { %v520_v2 = vadd.f32 %v519_v1, %v517_v33  ;;  %v1424_v33 = vpack.c.bf16 %v769_v32, %v768_v31 }
 0x353   : > { %v542_v3 = vmul.f32 0.00390625, %v520_v2 }
 0x354   : > { %v540_v4 = vpop.permute.xlu1 %539 }
 0x355   : > { %v541_v5 = vadd.f32 %v540_v4, %v538_v49  ;;  %v544_v6 = vmul.f32 %v542_v3, %v542_v3  ;;  %v549_v13 = vrot.slane %v542_v3, %v1950_v12  ;;  %v779_v49 = vld [vmem:[#allocation7 + $0x178] sm:$0xff] }
 0x356   : > { %v1444_v50 = vpack.c.bf16 %v779_v49, %v778_v47 }
 0x357   : > { %v543_v7 = vmul.f32 0.00390625, %v541_v5  ;;  %v550_v15 = vsub.f32 %v1936_v48, %v549_v13  ;;  %v551_v16 = vsub.f32 %v1932_v46, %v549_v13  ;;  %v1420_v46 = vpack.c.bf16 %v767_v23, %v766_v22 }
 0x359   : > { %v545_v9 = vsub.f32 %v543_v7, %v544_v6 }
 0x35b   : > { %v552_v10 = vadd.f32 1e-05, %v545_v9 }
 0x35d   : > { %1530 = vrsqrt.f32 %v552_v10 }
 0x367   : > { %v1531_v14 = vpop.eup %1530 }
 0x368   : > { %v557_v17 = vrot.slane %v1531_v14, %v1950_v12 }
 0x36a   : > { %v558_v18 = vmul.f32 %v557_v17, %v550_v15  ;;  %v559_v19 = vmul.f32 %v557_v17, %v551_v16 }
 0x36c   : > { %vm560_vm3 = vcmp.ge.f32.partialorder %v558_v18, 0.0  ;;  %v562_v20 = vmul.f32 0.01, %v558_v18  ;;  %vm561_vm4 = vcmp.ge.f32.partialorder %v559_v19, 0.0  ;;  %v563_v21 = vmul.f32 0.01, %v559_v19 }
 0x36e   : > { %v564_v24 = vsel %vm560_vm3, %v558_v18, %v562_v20  ;;  %v565_v25 = vsel %vm561_vm4, %v559_v19, %v563_v21 }
 0x36f   : > { %v574_v26 = vrot.slane %v564_v24, 1  ;;  %1231 = vmatprep.mubr.f32.mxu0 %v564_v24  ;;  %v569_v27 = vrot.slane %v565_v25, 7  ;;  %v575_v48 = vrot.slane %v565_v25, 1  ;;  %v568_v28 = vrot.slane %v564_v24, 7 }
 0x370   : > { %1232 = vmatmul.mubr.f32.vlgmr.msra.gmra.mrb[2].mxu0 %v565_v25 }
 0x371   : > { %1266 = vmatprep.mubr.msk.f32.mxu1 %vm1048_vm5, %v568_v28  ;;  %v570_v29 = vsel %vm222_vm1, %v568_v28, %v569_v27  ;;  %v576_v30 = vsel %vm228_vm2, %v574_v26, %v575_v48 }
 0x372   : > { %1267 = vmatmul.mubr.f32.vlgmr.msra.gmra.mrb[0].mxu1 %v570_v29 }
 0x373   : > { %1419 = vmatpush3.bf16.msra.mxu1 %v1416_v0  ;;  %1301 = vmatprep.mubr.f32.mxu1 %v576_v30 }
 0x374   : > { %1421 = vmatprep.subr.bf16.mxu1 %v1420_v46 }
 0x377   : > { %1423 = vmatpush3.bf16.msra.mxu1 %v1420_v46 }
 0x378   : > { %1425 = vmatprep.subr.bf16.mxu1 %v1424_v33 }
 0x37b   : > { %1427 = vmatpush3.bf16.msra.mxu1 %v1424_v33 }
 0x37c   : > { %1429 = vmatprep.subr.bf16.mxu1 %v1428_v36 }
 0x37f   : > { %1431 = vmatpush3.bf16.msra.mxu1 %v1428_v36 }
 0x380   : > { %1433 = vmatprep.subr.bf16.mxu1 %v1432_v39 }
 0x383   : > { %1435 = vmatpush3.bf16.msra.mxu1 %v1432_v39 }
 0x384   : > { %1437 = vmatprep.subr.bf16.mxu1 %v1436_v42 }
 0x387   : > { %1439 = vmatpush3.bf16.msra.mxu1 %v1436_v42 }
 0x388   : > { %1441 = vmatprep.subr.bf16.mxu1 %v1440_v45 }
 0x38b   : > { %1443 = vmatpush3.bf16.msra.mxu1 %v1440_v45 }
 0x38c   : > { %1445 = vmatprep.subr.bf16.mxu1 %v1444_v50 }
 0x38f   : > { %1447 = vmatpush3.bf16.msra.mxu1 %v1444_v50 }
 0x392   : > { %1302 = vmatmul.mubr.msk.f32.vlgmr.msra.gmra.mrb[0].mxu1 %vm228_vm2, %v575_v48 }
 0x443   : > { %v1233_v51 = vpop.f32.mrb[2].mxu0 }
 0x444   : > { %v679_v52 = vpop.f32.mrb[3].mxu0 }
 0x465   : > { %v1303_v53 = vpop.f32.mrb[0].mxu1 }
 0x466   : > { %v1448_v54 = vadd.f32 %v1303_v53, %v1233_v51  ;;  %v846_v55 = vpop.f32.mrb[1].mxu1 }
 0x467   : > { %v1449_v56 = vadd.f32 %v846_v55, %v679_v52 }
 0x468   : > { %v877_v57 = vmul.f32 %v1448_v54, %v1448_v54 }
 0x469   : > { %v857_v58 = vadd.f32 %v1449_v56, %v1448_v54  ;;  %v876_v59 = vmul.f32 %v1449_v56, %v1449_v56 }
 0x46b   : > { %v858_v60 = vrot.slane %v857_v58, 4  ;;  %v878_v61 = vadd.f32 %v877_v57, %v876_v59 }
 0x46d   : > { %v859_v62 = vadd.f32 %v858_v60, %v857_v58  ;;  %v879_v63 = vrot.slane %v878_v61, 4 }
 0x46f   : > { %v860_v0 = vrot.slane %v859_v62, 2  ;;  %v880_v1 = vadd.f32 %v879_v63, %v878_v61 }
 0x471   : > { %v861_v2 = vadd.f32 %v860_v0, %v859_v62  ;;  %v881_v3 = vrot.slane %v880_v1, 2 }
 0x473   : > { %v862_v4 = vrot.slane %v861_v2, 1  ;;  %v882_v5 = vadd.f32 %v881_v3, %v880_v1 }
 0x475   : > { %v863_v6 = vadd.f32 %v862_v4, %v861_v2  ;;  %v883_v7 = vrot.slane %v882_v5, 1 }
 0x477   : > { %864 = vrot.lane.b32.xlu0 %v863_v6, %s1697_s18  ;;  %v884_v8 = vadd.f32 %v883_v7, %v882_v5 }
 0x479   : > { %885 = vrot.lane.b32.xlu1 %v884_v8, %s1697_s18 }
 0x4e9   : > { %v865_v9 = vpop.permute.xlu0 %864 }
 0x4ea   : > { %v866_v10 = vadd.f32 %v865_v9, %v863_v6 }
 0x4eb   : > { %v886_v11 = vpop.permute.xlu1 %885 }
 0x4ec   : > { %v887_v13 = vadd.f32 %v886_v11, %v884_v8  ;;  %867 = vrot.lane.b32.xlu0 %v866_v10, %s1698_s20 }
 0x4ee   : > { %888 = vrot.lane.b32.xlu1 %v887_v13, %s1698_s20 }
 0x55e   : > { %v868_v14 = vpop.permute.xlu0 %867 }
 0x55f   : > { %v869_v15 = vadd.f32 %v868_v14, %v866_v10 }
 0x560   : > { %v889_v16 = vpop.permute.xlu1 %888 }
 0x561   : > { %v890_v17 = vadd.f32 %v889_v16, %v887_v13  ;;  %870 = vrot.lane.b32.xlu0 %v869_v15, %s1699_s7 }
 0x563   : > { %891 = vrot.lane.b32.xlu1 %v890_v17, %s1699_s7 }
 0x5d3   : > { %v871_v18 = vpop.permute.xlu0 %870 }
 0x5d4   : > { %v872_v19 = vadd.f32 %v871_v18, %v869_v15 }
 0x5d5   : > { %v892_v20 = vpop.permute.xlu1 %891 }
 0x5d6   : > { %v893_v21 = vadd.f32 %v892_v20, %v890_v17  ;;  %873 = vrot.lane.b32.xlu0 %v872_v19, %s1700_s8 }
 0x5d8   : > { %894 = vrot.lane.b32.xlu1 %v893_v21, %s1700_s8 }
 0x648   : > { %v874_v22 = vpop.permute.xlu0 %873 }
 0x649   : > { %v875_v23 = vadd.f32 %v874_v22, %v872_v19 }
 0x64a   : > { %v895_v24 = vpop.permute.xlu1 %894 }
 0x64b   : > { %v897_v25 = vmul.f32 0.00390625, %v875_v23  ;;  %v896_v26 = vadd.f32 %v895_v24, %v893_v21 }
 0x64d   : > { %v899_v27 = vmul.f32 %v897_v25, %v897_v25  ;;  %v898_v48 = vmul.f32 0.00390625, %v896_v26  ;;  %v904_v29 = vrot.slane %v897_v25, %v1950_v12 }
 0x64f   : > { %v900_v28 = vsub.f32 %v898_v48, %v899_v27  ;;  %v905_v31 = vsub.f32 %v1449_v56, %v904_v29  ;;  %v906_v32 = vsub.f32 %v1448_v54, %v904_v29 }
 0x651   : > { %v907_v46 = vadd.f32 1e-05, %v900_v28 }
 0x653   : > { %1532 = vrsqrt.f32 %v907_v46 }
 0x65d   : > { %v1533_v30 = vpop.eup %1532 }
 0x65e   : > { %v912_v33 = vrot.slane %v1533_v30, %v1950_v12 }
 0x660   : > { %v913_v34 = vmul.f32 %v912_v33, %v905_v31  ;;  %v914_v35 = vmul.f32 %v912_v33, %v906_v32 }
 0x662   : > { %v917_v36 = vmul.f32 0.01, %v913_v34  ;;  %v918_v37 = vmul.f32 0.01, %v914_v35  ;;  %vm915_vm6 = vcmp.ge.f32.partialorder %v913_v34, 0.0  ;;  %vm916_vm7 = vcmp.ge.f32.partialorder %v914_v35, 0.0 }
 0x664   : > { %v919_v12 = vsel %vm915_vm6, %v913_v34, %v917_v36  ;;  %v920_v38 = vsel %vm916_vm7, %v914_v35, %v918_v37 }
 0x665   : > { %921 = vst [vmem:[%s217_s27] sm:$0xff] %v919_v12  ;;  %922 = vst [vmem:[%s217_s27 + $0x8] sm:$0xff] %v920_v38 }
 0x666   : > { %1633 = shalt.err (!%p1630_p1)
}
 0x667   : > { %s1634_s30 = scalar_lea.hbm %s1976_s25, 256  ;;  %s1638_s20 = scalar_lea.hbm %s2026_s3, 512 }
 0x668   : > { %p1635_p13 = scmp.ne.s32.totalorder %s1976_s25, %s1634_s30  ;;  %p1639_p4 = scmp.lt.u32.totalorder %s1976_s25, %s2026_s3 }
 0x669   : > { %p1640_p5 = scmp.lt.u32.totalorder %s1638_s20, %s1634_s30  ;;  %p1642_p11 = scmp.lt.u32.totalorder %s1634_s30, %s1976_s25 }
 0x66a   : > { %p1636_p6 = pnand %p1635_p13, %p2040_p0 }
 0x66b   : > { %p1641_p8 = por %p1640_p5, %p1639_p4 }
 0x66c   : > { %p1637_p10 = pneg %p1636_p6 }
 0x66d   : > { %p1643_p2 = por %p1642_p11, %p1641_p8 }
 0x66f   : > { %p1644_p3 = pnand %p1643_p2, %p1637_p10 }
 0x671   : > { %1647 = shalt.err (!%p1644_p3)
}
 0x672   : > { %s1702_s24 = smov 128  }
 0x673   : > { %1466 = dma.vmem_to_hbm [thread:$0]  (%p2040_p0), %s1978_s22, 256, %s1976_s25, %s924_s16, %s1702_s24, %s1702_s24, %s1697_s18  }
 0x674 PF: > { %s952_s27 = sand.u32 1, %s1678_s12   ;;  %p2041_p7 = scmp.ne.s32.totalorder %s2031_s19, 0 }
 0x675   : > { %p2042_p9 = scmp.ge.s32.totalorder %s1690_s15, 2  ;;  %s953_s5 = scalar_lea.sflag [#allocation4], %s952_s27 }
 0x677   : > { %p1480_p12 = pnand %p2042_p9, %p2041_p7 }
 0x679   : > { %1673 = dma.done.wait (!%p1480_p12), %s953_s5, 256  }
 0x67a   : > { %1675 = vsyncadd (!%p1480_p12), %s953_s5, 4294967040  ;;  %p17_p1 = scmp.ge.s32.totalorder %s1839_s23, 4   ;;  %s2043_s12 = smov %s1682_s13 }
 0x67b   : > { %s2044_s13 = smov %s1686_s14  ;;  %s2045_s14 = smov %s1855_s9 }
 0x67c   : > { %s2046_s15 = smov %s1839_s23  ;;  %19 = sbr.rel (!%p17_p1) target bundleno = 6 (0x6), region = 89 }
 0x683   :  { %958 = vsyncpa [#allocation3], 1 }
 0x684   :  { %960 = vsyncpa [#allocation3 + $0x1], 1 }
 0x685   :  { %961 = vsyncpa [#allocation6], 1 }
 0x686   :  { %962 = vsyncpa [#allocation4], 1 }
 0x687   :  { %964 = vsyncpa [#allocation4 + $0x1], 1 }

</bundles_post_ra>
